<compile_context>
chip_gen: v6e
topology: v6e:2x2x1
jax: 0.10.0
libtpu: 0.0.40
codegen_flags: <defaults>
</compile_context>

<pallas_src>
import functools
import math

import jax
import jax.numpy as jnp
from jax.experimental import pallas as pl
from jax.experimental.pallas import tpu as pltpu

BN_EPS = 1e-5
OP_DTYPE = jnp.bfloat16        # MXU-native matmul-operand dtype


def _round_up(v, m):
    return ((v + m - 1) // m) * m


# ----------------------------------------------------------------------------
# Init-time (fold-time) helpers: pure-jnp conv / transposed-conv used ONLY to
# turn each conv block into a dense transfer matrix.  Runs once on parameters.
# ----------------------------------------------------------------------------
def _im2col(x, k, stride, pad):
    """x: (B,C,H,W) -> ((B*Ho*Wo, C*k*k), Ho, Wo); patch order = (c, kh, kw)."""
    B, C, H, W = x.shape
    xp = jnp.pad(x, ((0, 0), (0, 0), (pad, pad), (pad, pad)))
    Ho = (H + 2 * pad - k) // stride + 1
    Wo = (W + 2 * pad - k) // stride + 1
    cols = []
    for di in range(k):
        for dj in range(k):
            cols.append(xp[:, :, di:di + stride * Ho:stride, dj:dj + stride * Wo:stride])
    patches = jnp.stack(cols, axis=2).reshape(B, C * k * k, Ho, Wo)
    return patches.transpose(0, 2, 3, 1).reshape(B * Ho * Wo, C * k * k), Ho, Wo


def _conv2d_nchw(x, w, stride, pad):
    """Conv2d(bias=False).  x: (B,Cin,H,W), w: (Cout,Cin,k,k) -> (B,Cout,Ho,Wo)."""
    Cout, Cin, k, _ = w.shape
    B = x.shape[0]
    cols, Ho, Wo = _im2col(x, k, stride, pad)
    y = cols @ w.reshape(Cout, Cin * k * k).T
    return y.reshape(B, Ho, Wo, Cout).transpose(0, 3, 1, 2)


def _deconv2d_nchw(x, w, stride, pad, out_pad):
    """ConvTranspose2d(bias=False).  w: (Cin,Cout,k,k) (PyTorch layout)."""
    Cin, Cout, k, _ = w.shape
    B, _, H, W = x.shape
    xd = jnp.zeros((B, Cin, (H - 1) * stride + 1, (W - 1) * stride + 1), x.dtype)
    xd = xd.at[:, :, ::stride, ::stride].set(x)
    p = k - 1 - pad
    xd = jnp.pad(xd, ((0, 0), (0, 0), (p, p + out_pad), (p, p + out_pad)))
    w_conv = jnp.transpose(w, (1, 0, 2, 3))[:, :, ::-1, ::-1]   # (Cout,Cin,k,k)
    return _conv2d_nchw(xd, w_conv, 1, 0)


def _operator_matrix(fn, in_shape):
    """Dense matrix T of the linear map `fn` over NCHW-flattened features.
    Returns (T, out_shape) such that flat_out = flat_in @ T."""
    din = math.prod(in_shape)
    eye = jnp.eye(din, dtype=jnp.float32).reshape((din,) + tuple(in_shape))
    out = fn(eye)
    return out.reshape(din, -1), tuple(out.shape[1:])


# ----------------------------------------------------------------------------
# Parameters (match the PyTorch module layout) + fold into kernel-ready form
# ----------------------------------------------------------------------------
def init_params(key, chip_size=16, base_nchans=4, bneck_size=3, num_conv_blocks=2):
    conv_out_dim = chip_size // (2 ** num_conv_blocks)
    conv_out_sz = base_nchans * 2 ** (num_conv_blocks - 1)
    lin_size = conv_out_dim * conv_out_dim * conv_out_sz
    num_back = num_conv_blocks // 2
    num_front = num_conv_blocks - num_back
    k_sizes = num_front * [5] + num_back * [3]

    keys = jax.random.split(key, num_conv_blocks + 6)
    Ws = []
    for i in range(num_conv_blocks):
        c_in = 1 if i == 0 else base_nchans * 2 ** (i - 1)
        c_out = base_nchans * 2 ** i
        k = k_sizes[i]
        bound = 1.0 / (c_in * k * k) ** 0.5
        Ws.append(jax.random.uniform(keys[i], (c_out, c_in, k, k),
                                     jnp.float32, -bound, bound))

    def linear(kw, kb, fan_in, fan_out):
        bound = 1.0 / fan_in ** 0.5
        W = jax.random.uniform(kw, (fan_out, fan_in), jnp.float32, -bound, bound)
        b = jax.random.uniform(kb, (fan_out,), jnp.float32, -bound, bound)
        return W, b

    kk = keys[num_conv_blocks:]
    return dict(
        Ws=Ws,
        bneck1=linear(kk[0], kk[1], lin_size, bneck_size),
        bneck2=linear(kk[2], kk[3], lin_size, bneck_size),
        fc=linear(kk[4], kk[5], bneck_size, lin_size),
        chip_size=chip_size,
        conv_out_dim=conv_out_dim,
        conv_out_sz=conv_out_sz,
        lin_size=lin_size,
        bneck_size=bneck_size,
    )


def fold_params(params, op_dtype=OP_DTYPE):
    """Precompute (once) everything the single fused forward kernel needs."""
    Ws = params["Ws"]
    n = len(Ws)
    chip = params["chip_size"]
    bneck = params["bneck_size"]
    lin = params["lin_size"]
    bn_scale = 1.0 / math.sqrt(1.0 + BN_EPS)   # eval-mode BN: identity affine

    # Encoder: Conv(stride=2, pad=k//2) + BN folded in.  All folding in f32,
    # final weights cast to bf16 (matmul-operand dtype).
    enc_mats = []
    shape = (1, chip, chip)
    for W in Ws:
        k = int(W.shape[2])
        T, shape = _operator_matrix(
            lambda e, W=W, k=k: _conv2d_nchw(e, W, 2, k // 2), shape)
        enc_mats.append((T * bn_scale).astype(op_dtype))

    # Decoder: ConvTranspose(stride=2, pad=k//2, out_pad=1) + BN folded in,
    # reversed order, shared weights (as in the PyTorch module).
    dec_mats = []
    shape = (params["conv_out_sz"], params["conv_out_dim"], params["conv_out_dim"])
    for i in range(n):
        W = Ws[n - 1 - i]
        k = int(W.shape[2])
        T, shape = _operator_matrix(
            lambda e, W=W, k=k: _deconv2d_nchw(e, W, 2, k // 2, 1), shape)
        dec_mats.append((T * bn_scale).astype(op_dtype))

    W1, b1 = params["bneck1"]
    W2, b2 = params["bneck2"]
    Wf, bf = params["fc"]

    # mu||logvar projection, zero-padded to a lane-dense (>=128) width so the
    # ml output block is written with full unmasked vector stores (review #3).
    ml_pad = _round_up(max(2 * bneck, 128), 128)
    wb = jnp.zeros((lin, ml_pad), jnp.float32)
    wb = wb.at[:, :bneck].set(W1.T).at[:, bneck:2 * bneck].set(W2.T)
    bb = jnp.zeros((1, ml_pad), jnp.float32)
    bb = bb.at[0, :bneck].set(b1).at[0, bneck:2 * bneck].set(b2)

    # Eval-mode reparameterize (z = mu): fold bneck1 and fc into ONE lane-dense
    # (lin, lin) matrix + (1, lin) bias, removing the two K=bneck fill/drain
    # bound matmuls from the decode path (review #4).
    wd = (W1.T @ Wf.T).astype(jnp.float32)          # (lin, lin)
    bd = (b1 @ Wf.T + bf).reshape(1, -1)            # (1, lin)

    return dict(
        enc_mats=enc_mats, dec_mats=dec_mats,
        bneck_w=wb.astype(op_dtype), bneck_b=bb.astype(jnp.float32),
        dec_in_w=wd.astype(op_dtype), dec_in_b=bd.astype(jnp.float32),
        chip_size=chip, bneck_size=bneck, ml_pad=ml_pad,
        num_conv_blocks=n, op_dtype=op_dtype,
    )


# ----------------------------------------------------------------------------
# Single fused Pallas kernel: whole forward for one batch tile, VMEM-resident
# ----------------------------------------------------------------------------
def _fused_forward_kernel(*refs, n_blocks, op_dtype):
    it = iter(refs)
    x_ref = next(it)
    enc_refs = [next(it) for _ in range(n_blocks)]
    wb_ref = next(it)                     # (lin, ml_pad)  mu||logvar (padded)
    bb_ref = next(it)                     # (1, ml_pad)
    wd_ref = next(it)                     # (lin, lin)     bneck1 . fc folded
    bd_ref = next(it)                     # (1, lin)
    dec_refs = [next(it) for _ in range(n_blocks)]
    ml_ref = next(it)
    recon_ref = next(it)

    # ---- encoder: lane-dense bf16 matmuls (BN folded into weights) + ReLU
    h = x_ref[...]
    for enc_ref in enc_refs:
        h = jnp.maximum(
            jnp.dot(h, enc_ref[...], preferred_element_type=jnp.float32),
            0.0).astype(op_dtype)

    # ---- bottleneck: fused, lane-padded mu||logvar projection (128+ lanes)
    ml_ref[...] = (jnp.dot(h, wb_ref[...], preferred_element_type=jnp.float32)
                   + bb_ref[...])

    # ---- decode from z = mu: bneck1∘fc is pre-folded into one (lin x lin)
    #      matrix, so no degenerate K=bneck matmuls appear at runtime.
    d = (jnp.dot(h, wd_ref[...], preferred_element_type=jnp.float32)
         + bd_ref[...]).astype(op_dtype)
    for i, dec_ref in enumerate(dec_refs):
        d = jnp.dot(d, dec_ref[...], preferred_element_type=jnp.float32)
        if i < n_blocks - 1:
            d = jnp.maximum(d, 0.0).astype(op_dtype)   # last block: BN only
    recon_ref[...] = jax.nn.sigmoid(d)                 # EUP transcendental, fused


def cropnet_ae_forward(x, folded, *, batch_tile=256):
    chip = folded["chip_size"]
    n = folded["num_conv_blocks"]
    bneck = folded["bneck_size"]
    ml_pad = folded["ml_pad"]
    op_dtype = folded["op_dtype"]

    x_flat = x.reshape(-1, chip * chip).astype(op_dtype)   # NCHW flatten (C=1)
    B, in_dim = x_flat.shape

    # Batch tile: multiple of 8 sublanes, min 8, capped at batch_tile; pad B
    # so every grid step works on a full tile (no partial-tile garbage rows).
    bt = batch_tile if B > batch_tile else max(8, _round_up(B, 8))
    bt = _round_up(bt, 8)
    Bp = _round_up(B, bt)
    if Bp != B:
        x_flat = jnp.pad(x_flat, ((0, Bp - B), (0, 0)))
    grid = (Bp // bt,)
    # TODO(synk): on v7x (2 TCs) co-tune bt so Bp // bt is even for balanced
    # megacore sharding of large batches.

    enc = folded["enc_mats"]
    dec = folded["dec_mats"]
    weights = list(enc) + [folded["bneck_w"], folded["bneck_b"],
                           folded["dec_in_w"], folded["dec_in_b"]] + list(dec)

    def full_spec(a):
        # Constant index_map: the block never changes, weights stay resident.
        # TODO(synk): single-buffer these (pipeline_mode=pl.Buffered(1)) once
        # larger chip_size configs press the VMEM budget.
        return pl.BlockSpec(a.shape, lambda i: (0,) * a.ndim)

    in_specs = [pl.BlockSpec((bt, in_dim), lambda i: (i, 0))]
    in_specs += [full_spec(w) for w in weights]

    out_dim = dec[-1].shape[1]
    out_shape = (jax.ShapeDtypeStruct((Bp, ml_pad), jnp.float32),
                 jax.ShapeDtypeStruct((Bp, out_dim), jnp.float32))
    out_specs = (pl.BlockSpec((bt, ml_pad), lambda i: (i, 0)),
                 pl.BlockSpec((bt, out_dim), lambda i: (i, 0)))

    kernel = functools.partial(_fused_forward_kernel, n_blocks=n, op_dtype=op_dtype)
    ml, recon_flat = pl.pallas_call(
        kernel,
        out_shape=out_shape,
        grid=grid,
        in_specs=in_specs,
        out_specs=out_specs,
        compiler_params=pltpu.CompilerParams(
            dimension_semantics=("parallel",),      # shard batch tiles across TCs
            vmem_limit_bytes=32 * 1024 * 1024,      # explicit budget (usage ~2 MiB)
        ),
    )(x_flat, *weights)

    mu = ml[:B, :bneck]
    logvar = ml[:B, bneck:2 * bneck]
    recon = recon_flat[:B].reshape(-1, 1, chip, chip)
    return recon, mu, logvar


# ----------------------------------------------------------------------------
# Pure-JAX unfused f32 reference (per-layer), used only for validation
# ----------------------------------------------------------------------------
def _reference_forward(x, params):
    chip = params["chip_size"]
    x = x.reshape(-1, 1, chip, chip).astype(jnp.float32)
    B = x.shape[0]
    Ws = params["Ws"]
    n = len(Ws)
    bn = 1.0 / math.sqrt(1.0 + BN_EPS)

    h = x
    for W in Ws:
        k = int(W.shape[2])
        h = jnp.maximum(_conv2d_nchw(h, W, 2, k // 2) * bn, 0.0)
    h = h.reshape(B, params["lin_size"])
    W1, b1 = params["bneck1"]
    W2, b2 = params["bneck2"]
    mu = h @ W1.T + b1
    logvar = h @ W2.T + b2
    Wf, bf = params["fc"]
    d = (mu @ Wf.T + bf).reshape(B, params["conv_out_sz"],
                                 params["conv_out_dim"], params["conv_out_dim"])
    for i in range(n):
        W = Ws[n - 1 - i]
        k = int(W.shape[2])
        d = _deconv2d_nchw(d, W, 2, k // 2, 1) * bn
        if i < n - 1:
            d = jnp.maximum(d, 0.0)
    recon = jax.nn.sigmoid(d).reshape(-1, 1, chip, chip)
    return recon, mu, logvar


# ----------------------------------------------------------------------------
if __name__ == "__main__":
    key = jax.random.PRNGKey(0)
    pkey, xkey = jax.random.split(key)

    # small config: chip_size=16, base_nchans=4, bneck_size=3, 2 conv blocks
    params = init_params(pkey, chip_size=16, base_nchans=4,
                         bneck_size=3, num_conv_blocks=2)
    folded = fold_params(params)    # one-time weight/BN folding (bf16 operands)

    x = jax.random.normal(xkey, (2, 1, 16, 16), jnp.float32)

    recon, mu, logvar = cropnet_ae_forward(x, folded)
    jax.block_until_ready((recon, mu, logvar))

    assert recon.shape == (2, 1, 16, 16), recon.shape
    assert mu.shape == (2, 3), mu.shape
    assert logvar.shape == (2, 3), logvar.shape
    assert bool(jnp.all(jnp.isfinite(recon)))
    assert bool(jnp.all((recon >= 0.0) & (recon <= 1.0)))   # sigmoid output range

    # numerical check vs an unfused pure-f32 reference; tolerance loosened to
    # cover the bf16 matmul-operand cast (per performance review).
    r_ref, mu_ref, lv_ref = _reference_forward(x, params)
    assert bool(jnp.allclose(recon, r_ref, atol=5e-2, rtol=5e-2)), "recon mismatch"
    assert bool(jnp.allclose(mu, mu_ref, atol=5e-2, rtol=5e-2)), "mu mismatch"
    assert bool(jnp.allclose(logvar, lv_ref, atol=5e-2, rtol=5e-2)), "logvar mismatch"

    print("KERNEL_OK")
</pallas_src>

<mosaic_0001>
module attributes {stable_mosaic.version = 11 : i64} {
  func.func @_fused_forward_kernel(%arg0: i32, %arg1: memref<8x256xbf16, #tpu.memory_space<vmem>>, %arg2: memref<256x256xbf16, #tpu.memory_space<vmem>>, %arg3: memref<256x128xbf16, #tpu.memory_space<vmem>>, %arg4: memref<128x128xbf16, #tpu.memory_space<vmem>>, %arg5: memref<1x128xf32, #tpu.memory_space<vmem>>, %arg6: memref<128x128xbf16, #tpu.memory_space<vmem>>, %arg7: memref<1x128xf32, #tpu.memory_space<vmem>>, %arg8: memref<128x256xbf16, #tpu.memory_space<vmem>>, %arg9: memref<256x256xbf16, #tpu.memory_space<vmem>>, %arg10: memref<8x128xf32, #tpu.memory_space<vmem>>, %arg11: memref<8x256xf32, #tpu.memory_space<vmem>>) attributes {dimension_semantics = [#tpu.dimension_semantics<parallel>], iteration_bounds = array<i64: 1>, scalar_prefetch = 0 : i64, scratch_operands = 0 : i64, tpu.core_type = #tpu.core_type<tc>, window_params = [{transform_indices = @transform_0, window_bounds = array<i64: 8, 256>}, {pipeline_mode = #tpu.pipeline_mode<synchronous>, transform_indices = @transform_1, window_bounds = array<i64: 256, 256>}, {pipeline_mode = #tpu.pipeline_mode<synchronous>, transform_indices = @transform_2, window_bounds = array<i64: 256, 128>}, {pipeline_mode = #tpu.pipeline_mode<synchronous>, transform_indices = @transform_3, window_bounds = array<i64: 128, 128>}, {pipeline_mode = #tpu.pipeline_mode<synchronous>, transform_indices = @transform_4, window_bounds = array<i64: 1, 128>}, {pipeline_mode = #tpu.pipeline_mode<synchronous>, transform_indices = @transform_5, window_bounds = array<i64: 128, 128>}, {pipeline_mode = #tpu.pipeline_mode<synchronous>, transform_indices = @transform_6, window_bounds = array<i64: 1, 128>}, {pipeline_mode = #tpu.pipeline_mode<synchronous>, transform_indices = @transform_7, window_bounds = array<i64: 128, 256>}, {pipeline_mode = #tpu.pipeline_mode<synchronous>, transform_indices = @transform_8, window_bounds = array<i64: 256, 256>}, {transform_indices = @transform_9, window_bounds = array<i64: 8, 128>}, {transform_indices = @transform_10, window_bounds = array<i64: 8, 256>}]} {
    %c0 = arith.constant 0 : index
    %c0_0 = arith.constant 0 : index
    %0 = vector.load %arg1[%c0, %c0_0] : memref<8x256xbf16, #tpu.memory_space<vmem>>, vector<8x256xbf16>
    %c0_1 = arith.constant 0 : index
    %c0_2 = arith.constant 0 : index
    %1 = vector.load %arg2[%c0_1, %c0_2] : memref<256x256xbf16, #tpu.memory_space<vmem>>, vector<256x256xbf16>
    %cst = arith.constant dense<0.000000e+00> : vector<8x256xf32>
    %2 = tpu.matmul %0, %1, %cst {dimension_numbers = #tpu.dot_dimension_numbers<[1], [0], [0], [1], [0, 0, 1, 1], [], []>} : vector<8x256xbf16>, vector<256x256xbf16>, vector<8x256xf32> -> vector<8x256xf32>
    %cst_3 = arith.constant 0.000000e+00 : f32
    %3 = vector.broadcast %cst_3 : f32 to vector<8x256xf32>
    %4 = arith.maximumf %2, %3 : vector<8x256xf32>
    %5 = arith.truncf %4 : vector<8x256xf32> to vector<8x256xbf16>
    %c0_4 = arith.constant 0 : index
    %c0_5 = arith.constant 0 : index
    %6 = vector.load %arg3[%c0_4, %c0_5] : memref<256x128xbf16, #tpu.memory_space<vmem>>, vector<256x128xbf16>
    %cst_6 = arith.constant dense<0.000000e+00> : vector<8x128xf32>
    %7 = tpu.matmul %5, %6, %cst_6 {dimension_numbers = #tpu.dot_dimension_numbers<[1], [0], [0], [1], [0, 0, 1, 1], [], []>} : vector<8x256xbf16>, vector<256x128xbf16>, vector<8x128xf32> -> vector<8x128xf32>
    %cst_7 = arith.constant 0.000000e+00 : f32
    %8 = vector.broadcast %cst_7 : f32 to vector<8x128xf32>
    %9 = arith.maximumf %7, %8 : vector<8x128xf32>
    %10 = arith.truncf %9 : vector<8x128xf32> to vector<8x128xbf16>
    %c0_8 = arith.constant 0 : index
    %c0_9 = arith.constant 0 : index
    %11 = vector.load %arg4[%c0_8, %c0_9] : memref<128x128xbf16, #tpu.memory_space<vmem>>, vector<128x128xbf16>
    %cst_10 = arith.constant dense<0.000000e+00> : vector<8x128xf32>
    %12 = tpu.matmul %10, %11, %cst_10 {dimension_numbers = #tpu.dot_dimension_numbers<[1], [0], [0], [1], [0, 0, 1, 1], [], []>} : vector<8x128xbf16>, vector<128x128xbf16>, vector<8x128xf32> -> vector<8x128xf32>
    %c0_11 = arith.constant 0 : index
    %c0_12 = arith.constant 0 : index
    %13 = vector.load %arg5[%c0_11, %c0_12] : memref<1x128xf32, #tpu.memory_space<vmem>>, vector<1x128xf32>
    %14 = vector.broadcast %13 : vector<1x128xf32> to vector<8x128xf32>
    %15 = arith.addf %12, %14 : vector<8x128xf32>
    %c0_13 = arith.constant 0 : index
    %c0_14 = arith.constant 0 : index
    %16 = vector.load %arg10[%c0_13, %c0_14] : memref<8x128xf32, #tpu.memory_space<vmem>>, vector<8x128xf32>
    tpu.vector_store %arg10[%c0_13, %c0_14], %15 {strides = array<i32>} : memref<8x128xf32, #tpu.memory_space<vmem>>, vector<8x128xf32>,
    %c0_15 = arith.constant 0 : index
    %c0_16 = arith.constant 0 : index
    %17 = vector.load %arg6[%c0_15, %c0_16] : memref<128x128xbf16, #tpu.memory_space<vmem>>, vector<128x128xbf16>
    %cst_17 = arith.constant dense<0.000000e+00> : vector<8x128xf32>
    %18 = tpu.matmul %10, %17, %cst_17 {dimension_numbers = #tpu.dot_dimension_numbers<[1], [0], [0], [1], [0, 0, 1, 1], [], []>} : vector<8x128xbf16>, vector<128x128xbf16>, vector<8x128xf32> -> vector<8x128xf32>
    %c0_18 = arith.constant 0 : index
    %c0_19 = arith.constant 0 : index
    %19 = vector.load %arg7[%c0_18, %c0_19] : memref<1x128xf32, #tpu.memory_space<vmem>>, vector<1x128xf32>
    %20 = vector.broadcast %19 : vector<1x128xf32> to vector<8x128xf32>
    %21 = arith.addf %18, %20 : vector<8x128xf32>
    %22 = arith.truncf %21 : vector<8x128xf32> to vector<8x128xbf16>
    %c0_20 = arith.constant 0 : index
    %c0_21 = arith.constant 0 : index
    %23 = vector.load %arg8[%c0_20, %c0_21] : memref<128x256xbf16, #tpu.memory_space<vmem>>, vector<128x256xbf16>
    %cst_22 = arith.constant dense<0.000000e+00> : vector<8x256xf32>
    %24 = tpu.matmul %22, %23, %cst_22 {dimension_numbers = #tpu.dot_dimension_numbers<[1], [0], [0], [1], [0, 0, 1, 1], [], []>} : vector<8x128xbf16>, vector<128x256xbf16>, vector<8x256xf32> -> vector<8x256xf32>
    %cst_23 = arith.constant 0.000000e+00 : f32
    %25 = vector.broadcast %cst_23 : f32 to vector<8x256xf32>
    %26 = arith.maximumf %24, %25 : vector<8x256xf32>
    %27 = arith.truncf %26 : vector<8x256xf32> to vector<8x256xbf16>
    %c0_24 = arith.constant 0 : index
    %c0_25 = arith.constant 0 : index
    %28 = vector.load %arg9[%c0_24, %c0_25] : memref<256x256xbf16, #tpu.memory_space<vmem>>, vector<256x256xbf16>
    %cst_26 = arith.constant dense<0.000000e+00> : vector<8x256xf32>
    %29 = tpu.matmul %27, %28, %cst_26 {dimension_numbers = #tpu.dot_dimension_numbers<[1], [0], [0], [1], [0, 0, 1, 1], [], []>} : vector<8x256xbf16>, vector<256x256xbf16>, vector<8x256xf32> -> vector<8x256xf32>
    %30 = arith.negf %29 : vector<8x256xf32>
    %31 = math.exp %30 : vector<8x256xf32>
    %cst_27 = arith.constant 1.000000e+00 : f32
    %32 = vector.broadcast %cst_27 : f32 to vector<8x256xf32>
    %33 = arith.addf %32, %31 : vector<8x256xf32>
    %34 = arith.divf %32, %33 : vector<8x256xf32>
    %c0_28 = arith.constant 0 : index
    %c0_29 = arith.constant 0 : index
    %35 = vector.load %arg11[%c0_28, %c0_29] : memref<8x256xf32, #tpu.memory_space<vmem>>, vector<8x256xf32>
    tpu.vector_store %arg11[%c0_28, %c0_29], %34 {strides = array<i32>} : memref<8x256xf32, #tpu.memory_space<vmem>>, vector<8x256xf32>,
    return
  }
  func.func @transform_0(%arg0: i32) -> (i32, i32) {
    %c0_i32 = arith.constant 0 : i32
    %c0_i32_0 = arith.constant 0 : i32
    return %arg0, %c0_i32 : i32, i32
  }
  func.func @transform_1(%arg0: i32) -> (i32, i32) {
    %c0_i32 = arith.constant 0 : i32
    %c0_i32_0 = arith.constant 0 : i32
    %c0_i32_1 = arith.constant 0 : i32
    return %c0_i32, %c0_i32_0 : i32, i32
  }
  func.func @transform_2(%arg0: i32) -> (i32, i32) {
    %c0_i32 = arith.constant 0 : i32
    %c0_i32_0 = arith.constant 0 : i32
    %c0_i32_1 = arith.constant 0 : i32
    return %c0_i32, %c0_i32_0 : i32, i32
  }
  func.func @transform_3(%arg0: i32) -> (i32, i32) {
    %c0_i32 = arith.constant 0 : i32
    %c0_i32_0 = arith.constant 0 : i32
    %c0_i32_1 = arith.constant 0 : i32
    return %c0_i32, %c0_i32_0 : i32, i32
  }
  func.func @transform_4(%arg0: i32) -> (i32, i32) {
    %c0_i32 = arith.constant 0 : i32
    %c0_i32_0 = arith.constant 0 : i32
    %c0_i32_1 = arith.constant 0 : i32
    return %c0_i32, %c0_i32_0 : i32, i32
  }
  func.func @transform_5(%arg0: i32) -> (i32, i32) {
    %c0_i32 = arith.constant 0 : i32
    %c0_i32_0 = arith.constant 0 : i32
    %c0_i32_1 = arith.constant 0 : i32
    return %c0_i32, %c0_i32_0 : i32, i32
  }
  func.func @transform_6(%arg0: i32) -> (i32, i32) {
    %c0_i32 = arith.constant 0 : i32
    %c0_i32_0 = arith.constant 0 : i32
    %c0_i32_1 = arith.constant 0 : i32
    return %c0_i32, %c0_i32_0 : i32, i32
  }
  func.func @transform_7(%arg0: i32) -> (i32, i32) {
    %c0_i32 = arith.constant 0 : i32
    %c0_i32_0 = arith.constant 0 : i32
    %c0_i32_1 = arith.constant 0 : i32
    return %c0_i32, %c0_i32_0 : i32, i32
  }
  func.func @transform_8(%arg0: i32) -> (i32, i32) {
    %c0_i32 = arith.constant 0 : i32
    %c0_i32_0 = arith.constant 0 : i32
    %c0_i32_1 = arith.constant 0 : i32
    return %c0_i32, %c0_i32_0 : i32, i32
  }
  func.func @transform_9(%arg0: i32) -> (i32, i32) {
    %c0_i32 = arith.constant 0 : i32
    %c0_i32_0 = arith.constant 0 : i32
    return %arg0, %c0_i32 : i32, i32
  }
  func.func @transform_10(%arg0: i32) -> (i32, i32) {
    %c0_i32 = arith.constant 0 : i32
    %c0_i32_0 = arith.constant 0 : i32
    return %arg0, %c0_i32 : i32, i32
  }
}

</mosaic_0001>

<bundles_post_ra>
// kernel: tpu_custom_call.1
= control target key start
LH: loop header
LB: loop body
LE: loop exit
PB: predicated region body
PF: predicated region fallthrough
CT: control target
= control target key end

     0   :  { %16 = vsyncpa [#allocation3], 0  ;;  %s1903_s0 = inlined_call_operand.hbm [shape: bf16[8,256], index: 0, kind: input, shape index: {}]   ;;  %s1904_s1 = inlined_call_operand.hbm [shape: bf16[256,256], index: 1, kind: input, shape index: {}]   ;;  %s1905_s2 = inlined_call_operand.hbm [shape: bf16[256,128], index: 2, kind: input, shape index: {}]   ;;  %s1906_s3 = inlined_call_operand.hbm [shape: bf16[128,128], index: 3, kind: input, shape index: {}]   ;;  %s1907_s4 = inlined_call_operand.vmem [shape: f32[1,128], index: 4, kind: input, shape index: {}]   ;;  %s1908_s5 = inlined_call_operand.hbm [shape: bf16[128,128], index: 5, kind: input, shape index: {}]   ;;  %s1909_s6 = inlined_call_operand.vmem [shape: f32[1,128], index: 6, kind: input, shape index: {}]   ;;  %s1910_s7 = inlined_call_operand.hbm [shape: bf16[128,256], index: 7, kind: input, shape index: {}]   ;;  %s1911_s8 = inlined_call_operand.hbm [shape: bf16[256,256], index: 8, kind: input, shape index: {}]   ;;  %s1912_s9 = inlined_call_operand.hbm [shape: f32[8,128], index: 9, kind: output, shape index: {0}]   ;;  %s1913_s10 = inlined_call_operand.hbm [shape: f32[8,256], index: 10, kind: output, shape index: {1}]  }
   0x1   :  { %17 = vsyncpa [#allocation6], 0 }
   0x2   :  { %18 = vsyncpa [#allocation9], 0 }
   0x3   :  { %19 = vsyncpa [#allocation12], 0 }
   0x4   :  { %20 = vsyncpa [#allocation4], 0 }
   0x5   :  { %21 = vsyncpa [#allocation16], 0  ;;  %s1757_s13 = smov [#allocation5]  }
   0x6   :  { %s37_s14 = sshll.u32 %s1757_s13, 4  ;;  %s38_s14 = int_to_ptr.vmem [resolvable:$true] %s37_s14 }
   0x7   :  { %s1573_s15 = scalar_lea.vmem %s38_s14, 4096  ;;  %p1578_p1 = scmp.lt.s32.totalorder %s38_s14, %s38_s14 }
   0x8   :  { %p1574_p0 = scmp.ne.s32.totalorder %s38_s14, %s1573_s15  ;;  %p1579_p2 = scmp.lt.s32.totalorder %s1573_s15, %s1573_s15 }
   0xa   :  { %p1580_p3 = por %p1579_p2, %p1578_p1 }
   0xc   :  { %p1581_p4 = pnand %p1580_p3, %p1574_p0 }
   0xe   :  { %1584 = shalt.err (!%p1581_p4)
}
   0xf   :  { %s1758_s16 = smov 128   ;;  %s1759_s17 = smov 8  }
  0x10   :  { %43 = dma.hbm_to_vmem [thread:$0]  %s1904_s1, 4096, %s38_s14, [#allocation6], %s1758_s16, %s1758_s16, %s1759_s17  }
  0x11   :  { %s1760_s20 = smov [#allocation8]   ;;  %s1761_s22 = smov [#allocation11]  }
  0x12   :  { %s61_s21 = sshll.u32 %s1760_s20, 4  ;;  %s89_s23 = sshll.u32 %s1761_s22, 4  ;;  %s62_s21 = int_to_ptr.vmem [resolvable:$true] %s61_s21  ;;  %s90_s23 = int_to_ptr.vmem [resolvable:$true] %s89_s23 }
  0x13   :  { %s1593_s24 = scalar_lea.vmem %s62_s21, 1024  ;;  %p1598_p6 = scmp.lt.s32.totalorder %s62_s21, %s62_s21 }
  0x14   :  { %p1594_p5 = scmp.ne.s32.totalorder %s62_s21, %s1593_s24  ;;  %p1599_p7 = scmp.lt.s32.totalorder %s1593_s24, %s1593_s24 }
  0x16   :  { %p1600_p8 = por %p1599_p7, %p1598_p6 }
  0x18   :  { %p1601_p9 = pnand %p1600_p8, %p1594_p5 }
  0x1a   :  { %1604 = shalt.err (!%p1601_p9)
}
  0x1b   :  { %s1762_s25 = smov 64   ;;  %s1763_s26 = smov 4  }
  0x1c   :  { %67 = dma.hbm_to_vmem [thread:$0]  %s1906_s3, 1024, %s62_s21, [#allocation9], %s1762_s25, %s1762_s25, %s1763_s26  }
  0x1d   :  { %s1613_s1 = scalar_lea.vmem %s90_s23, 2048  ;;  %p1618_p11 = scmp.lt.s32.totalorder %s90_s23, %s90_s23 }
  0x1e   :  { %p1614_p10 = scmp.ne.s32.totalorder %s90_s23, %s1613_s1  ;;  %p1619_p12 = scmp.lt.s32.totalorder %s1613_s1, %s1613_s1 }
  0x20   :  { %p1620_p13 = por %p1619_p12, %p1618_p11 }
  0x22   :  { %p1621_p0 = pnand %p1620_p13, %p1614_p10 }
  0x24   :  { %1624 = shalt.err (!%p1621_p0)
}
  0x25   :  { %95 = dma.hbm_to_vmem [thread:$0]  %s1910_s7, 2048, %s90_s23, [#allocation12], %s1758_s16, %s1758_s16, %s1759_s17  }
  0x26   :  { %s1764_s11 = smov [#allocation2]   ;;  %s1765_s13 = smov [#allocation7]  }
  0x27   :  { %s28_s12 = sshll.u32 %s1764_s11, 4  ;;  %s49_s3 = sshll.u32 %s1765_s13, 4  ;;  %s29_s12 = int_to_ptr.vmem [resolvable:$true] %s28_s12  ;;  %s50_s3 = int_to_ptr.vmem [resolvable:$true] %s49_s3 }
  0x28   :  { %s1633_s14 = scalar_lea.vmem %s29_s12, 128  ;;  %p1638_p2 = scmp.lt.s32.totalorder %s29_s12, %s29_s12 }
  0x29   :  { %p1634_p1 = scmp.ne.s32.totalorder %s29_s12, %s1633_s14  ;;  %p1639_p3 = scmp.lt.s32.totalorder %s1633_s14, %s1633_s14 }
  0x2b   :  { %p1640_p4 = por %p1639_p3, %p1638_p2 }
  0x2d   :  { %p1641_p5 = pnand %p1640_p4, %p1634_p1 }
  0x2f   :  { %1644 = shalt.err (!%p1641_p5)
}
  0x30   :  { %31 = dma.hbm_to_vmem [thread:$0]  %s1903_s0, 128, %s29_s12, [#allocation3]  }
  0x31   :  { %s1653_s19 = scalar_lea.vmem %s50_s3, 2048  ;;  %p1658_p7 = scmp.lt.s32.totalorder %s50_s3, %s50_s3 }
  0x32   :  { %p1654_p6 = scmp.ne.s32.totalorder %s50_s3, %s1653_s19  ;;  %p1659_p8 = scmp.lt.s32.totalorder %s1653_s19, %s1653_s19 }
  0x34   :  { %p1660_p9 = por %p1659_p8, %p1658_p7 }
  0x36   :  { %p1661_p10 = pnand %p1660_p9, %p1654_p6 }
  0x38   :  { %1664 = shalt.err (!%p1661_p10)
}
  0x39   :  { %55 = dma.hbm_to_vmem [thread:$0]  %s1905_s2, 2048, %s50_s3, [#allocation6], %s1762_s25, %s1762_s25, %s1763_s26  }
  0x3a   :  { %s1766_s21 = smov [#allocation10]   ;;  %s1767_s23 = smov [#allocation13]  }
  0x3b   :  { %s75_s22 = sshll.u32 %s1766_s21, 4  ;;  %s101_s0 = sshll.u32 %s1767_s23, 4  ;;  %s76_s22 = int_to_ptr.vmem [resolvable:$true] %s75_s22  ;;  %s102_s0 = int_to_ptr.vmem [resolvable:$true] %s101_s0 }
  0x3c   :  { %s1673_s24 = scalar_lea.vmem %s76_s22, 1024  ;;  %p1678_p12 = scmp.lt.s32.totalorder %s76_s22, %s76_s22 }
  0x3d   :  { %p1674_p11 = scmp.ne.s32.totalorder %s76_s22, %s1673_s24  ;;  %p1679_p13 = scmp.lt.s32.totalorder %s1673_s24, %s1673_s24 }
  0x3f   :  { %p1680_p0 = por %p1679_p13, %p1678_p12 }
  0x41   :  { %p1681_p1 = pnand %p1680_p0, %p1674_p11 }
  0x43   :  { %1684 = shalt.err (!%p1681_p1)
}
  0x44   :  { %81 = dma.hbm_to_vmem [thread:$0]  %s1908_s5, 1024, %s76_s22, [#allocation9], %s1762_s25, %s1762_s25, %s1763_s26  }
  0x45   :  { %s1693_s2 = scalar_lea.vmem %s102_s0, 4096  ;;  %p1698_p3 = scmp.lt.s32.totalorder %s102_s0, %s102_s0 }
  0x46   :  { %p1694_p2 = scmp.ne.s32.totalorder %s102_s0, %s1693_s2  ;;  %p1699_p4 = scmp.lt.s32.totalorder %s1693_s2, %s1693_s2 }
  0x48   :  { %p1700_p5 = por %p1699_p4, %p1698_p3 }
  0x4a   :  { %p1701_p6 = pnand %p1700_p5, %p1694_p2 }
  0x4c   :  { %1704 = shalt.err (!%p1701_p6)
}
  0x4d   :  { %107 = dma.hbm_to_vmem [thread:$0]  %s1911_s8, 4096, %s102_s0, [#allocation12], %s1758_s16, %s1758_s16, %s1759_s17  }
  0x4e   :  { %1745 = dma.done.wait [#allocation3], 128  }
  0x4f   :  { %1746 = vsyncadd [#allocation3], 4294967168 }
  0x50   :  { %1747 = dma.done.wait [#allocation6], 6144  }
  0x51   :  { %1748 = vsyncadd [#allocation6], 4294961152 }
  0x52   :  { %1749 = dma.done.wait [#allocation9], 2048  }
  0x53   :  { %1750 = vsyncadd [#allocation9], 4294965248 }
  0x54   :  { %1751 = dma.done.wait [#allocation12], 6144  }
  0x55   :  { %1752 = vsyncadd [#allocation12], 4294961152  ;;  %v1403_v0 = vld [vmem:[#allocation5 + $0x74] ss:$8 sps:$4 sm:$0xff]   ;;  %v1405_v1 = vld [vmem:[#allocation5 + $0x70] ss:$8 sps:$4 sm:$0xff]  }
  0x56   :  { %330 = vmatprep.subr.bf16.mxu0 %v1403_v0  ;;  %v1406_v2 = vld [vmem:[#allocation5 + $0x64] ss:$8 sps:$4 sm:$0xff]   ;;  %v1408_v3 = vld [vmem:[#allocation5 + $0x60] ss:$8 sps:$4 sm:$0xff]   ;;  %v1409_v4 = vld [vmem:[#allocation5 + $0x54] ss:$8 sps:$4 sm:$0xff]  }
  0x57   :  { %331 = vmatpush1.bf16.msra.mxu0 %v1405_v1  ;;  %v1411_v5 = vld [vmem:[#allocation5 + $0x50] ss:$8 sps:$4 sm:$0xff]   ;;  %v1412_v6 = vld [vmem:[#allocation5 + $0x44] ss:$8 sps:$4 sm:$0xff]   ;;  %v1414_v7 = vld [vmem:[#allocation5 + $0x40] ss:$8 sps:$4 sm:$0xff]  }
  0x58   :  { %332 = vmatprep.subr.bf16.mxu0 %v1406_v2  ;;  %v1415_v8 = vld [vmem:[#allocation5 + $0x34] ss:$8 sps:$4 sm:$0xff]   ;;  %v1417_v9 = vld [vmem:[#allocation5 + $0x30] ss:$8 sps:$4 sm:$0xff]   ;;  %v1418_v10 = vld [vmem:[#allocation5 + $0x24] ss:$8 sps:$4 sm:$0xff]  }
  0x59   :  { %v1420_v11 = vld [vmem:[#allocation5 + $0x20] ss:$8 sps:$4 sm:$0xff]   ;;  %v1421_v12 = vld [vmem:[#allocation5 + $0x14] ss:$8 sps:$4 sm:$0xff]   ;;  %v1423_v13 = vld [vmem:[#allocation5 + $0x10] ss:$8 sps:$4 sm:$0xff]  }
  0x5a   :  { %v1867_v14 = vld [vmem:[#allocation2] sm:$0xff]  ;;  %v1424_v15 = vld [vmem:[#allocation5 + $0x4] ss:$8 sps:$4 sm:$0xff]   ;;  %v1455_v19 = vld [vmem:[#allocation7 + $0x70] sm:$0xff]   ;;  %v1768_v51 = vmov 0.0   ;;  %vm1769_vm0 = vmmov 0  }
  0x5b   :  { %333 = vmatpush1.bf16.msra.mxu0 %v1408_v3  ;;  %v1190_v16 = vcombine.high %v1867_v14, %v1867_v14  ;;  %v1453_v17 = vld [vmem:[#allocation7 + $0x78] sm:$0xff]   ;;  %v1426_v20 = vld [vmem:[#allocation5] ss:$8 sps:$4 sm:$0xff]   ;;  %v1456_v21 = vld [vmem:[#allocation7 + $0x30] sm:$0xff]   ;;  %v1189_v46 = vcombine.low %v1867_v14, %v1867_v14 }
  0x5c   :  { %334 = vmatprep.subr.bf16.mxu0 %v1409_v4  ;;  %v1454_v18 = vld [vmem:[#allocation7 + $0x38] sm:$0xff]   ;;  %1307 = vmatprep.subr.bf16.mxu1 %v1453_v17  ;;  %v1457_v22 = vld [vmem:[#allocation7 + $0x68] sm:$0xff]   ;;  %v1459_v27 = vld [vmem:[#allocation7 + $0x60] sm:$0xff]  }
  0x5d   :  { %362 = vmatprep.mubr.bf16.mxu0 %v1190_v16  ;;  %1308 = vmatpush3.bf16.msra.mxu1 %v1454_v18  ;;  %v1427_v23 = vld [vmem:[#allocation5 + $0xf4] ss:$8 sps:$4 sm:$0xff]   ;;  %v1429_v24 = vld [vmem:[#allocation5 + $0xf0] ss:$8 sps:$4 sm:$0xff]   ;;  %v1430_v25 = vld [vmem:[#allocation5 + $0xe4] ss:$8 sps:$4 sm:$0xff]  }
  0x5e   :  { %1309 = vmatprep.subr.bf16.mxu1 %v1455_v19  ;;  %v1458_v26 = vld [vmem:[#allocation7 + $0x28] sm:$0xff]   ;;  %v1460_v28 = vld [vmem:[#allocation7 + $0x20] sm:$0xff]   ;;  %v1461_v30 = vld [vmem:[#allocation7 + $0x58] sm:$0xff]  }
  0x5f   :  { %335 = vmatpush1.bf16.msra.mxu0 %v1411_v5  ;;  %v1432_v29 = vld [vmem:[#allocation5 + $0xe0] ss:$8 sps:$4 sm:$0xff]   ;;  %v1433_v31 = vld [vmem:[#allocation5 + $0xd4] ss:$8 sps:$4 sm:$0xff]   ;;  %v1435_v33 = vld [vmem:[#allocation5 + $0xd0] ss:$8 sps:$4 sm:$0xff]  }
  0x60   :  { %336 = vmatprep.subr.bf16.mxu0 %v1412_v6  ;;  %v1462_v32 = vld [vmem:[#allocation7 + $0x18] sm:$0xff]   ;;  %v1463_v34 = vld [vmem:[#allocation7 + $0x50] sm:$0xff]   ;;  %v1436_v35 = vld [vmem:[#allocation5 + $0xc4] ss:$8 sps:$4 sm:$0xff]  }
  0x61   :  { %1310 = vmatpush3.bf16.msra.mxu1 %v1456_v21  ;;  %v1464_v36 = vld [vmem:[#allocation7 + $0x10] sm:$0xff]   ;;  %v1438_v37 = vld [vmem:[#allocation5 + $0xc0] ss:$8 sps:$4 sm:$0xff]   ;;  %v1442_v40 = vld [vmem:[#allocation5 + $0xa4] ss:$8 sps:$4 sm:$0xff]  }
  0x62   :  { %1311 = vmatprep.subr.bf16.mxu1 %v1457_v22  ;;  %v1439_v38 = vld [vmem:[#allocation5 + $0xb4] ss:$8 sps:$4 sm:$0xff]   ;;  %v1441_v39 = vld [vmem:[#allocation5 + $0xb0] ss:$8 sps:$4 sm:$0xff]   ;;  %v1444_v41 = vld [vmem:[#allocation5 + $0xa0] ss:$8 sps:$4 sm:$0xff]  }
  0x63   :  { %337 = vmatpush1.bf16.msra.mxu0 %v1414_v7  ;;  %v1445_v42 = vld [vmem:[#allocation5 + $0x94] ss:$8 sps:$4 sm:$0xff]   ;;  %v1447_v43 = vld [vmem:[#allocation5 + $0x90] ss:$8 sps:$4 sm:$0xff]   ;;  %v1448_v44 = vld [vmem:[#allocation5 + $0x84] ss:$8 sps:$4 sm:$0xff]  }
  0x64   :  { %338 = vmatprep.subr.bf16.mxu0 %v1415_v8  ;;  %v1450_v45 = vld [vmem:[#allocation5 + $0x80] ss:$8 sps:$4 sm:$0xff]   ;;  %v1469_v58 = vld [vmem:[#allocation8 + $0x38] sm:$0xff]   ;;  %v1470_v61 = vld [vmem:[#allocation8 + $0x30] sm:$0xff]  }
  0x65   :  { %1312 = vmatpush3.bf16.msra.mxu1 %v1458_v26  ;;  %v1465_v47 = vld [vmem:[#allocation7 + $0x48] sm:$0xff]   ;;  %v1467_v49 = vld [vmem:[#allocation7 + $0x40] sm:$0xff]   ;;  %v1473_v0 = vld [vmem:[#allocation8 + $0x18] sm:$0xff]  }
  0x66   :  { %1313 = vmatprep.subr.bf16.mxu1 %v1459_v27  ;;  %v1466_v48 = vld [vmem:[#allocation7 + $0x8] sm:$0xff]   ;;  %v1468_v50 = vld [vmem:[#allocation7] sm:$0xff]   ;;  %v1474_v1 = vld [vmem:[#allocation8 + $0x10] sm:$0xff]  }
  0x67   :  { %339 = vmatpush1.bf16.msra.mxu0 %v1417_v9  ;;  %v1471_v62 = vld [vmem:[#allocation8 + $0x28] sm:$0xff]   ;;  %v1472_v63 = vld [vmem:[#allocation8 + $0x20] sm:$0xff]   ;;  %v1482_v16 = vld [vmem:[#allocation10 + $0x10] sm:$0xff]  }
  0x68   :  { %340 = vmatprep.subr.bf16.mxu0 %v1418_v10  ;;  %v1475_v2 = vld [vmem:[#allocation8 + $0x8] sm:$0xff]   ;;  %v1476_v3 = vld [vmem:[#allocation8] sm:$0xff]   ;;  %v1477_v10 = vld [vmem:[#allocation10 + $0x38] sm:$0xff]  }
  0x69   :  { %1314 = vmatpush3.bf16.msra.mxu1 %v1460_v28  ;;  %v1480_v14 = vld [vmem:[#allocation10 + $0x20] sm:$0xff]   ;;  %v1483_v17 = vld [vmem:[#allocation10 + $0x8] sm:$0xff]   ;;  %v1487_v19 = vld [vmem:[#allocation11 + $0x74] ss:$8 sps:$4 sm:$0xff]  }
  0x6a   :  { %1315 = vmatprep.subr.bf16.mxu1 %v1461_v30  ;;  %v1484_v18 = vld [vmem:[#allocation10] sm:$0xff]   ;;  %v1499_v27 = vld [vmem:[#allocation11 + $0x34] ss:$8 sps:$4 sm:$0xff]   ;;  %v1497_v28 = vld [vmem:[#allocation11 + $0x30] ss:$8 sps:$4 sm:$0xff]  }
  0x6b   :  { %341 = vmatpush1.bf16.msra.mxu0 %v1420_v11  ;;  %v1488_v21 = vld [vmem:[#allocation11 + $0x60] ss:$8 sps:$4 sm:$0xff]   ;;  %v1490_v22 = vld [vmem:[#allocation11 + $0x64] ss:$8 sps:$4 sm:$0xff]  }
  0x6c   :  { %342 = vmatprep.subr.bf16.mxu0 %v1421_v12  ;;  %v1478_v12 = vld [vmem:[#allocation10 + $0x30] sm:$0xff]   ;;  %v1494_v26 = vld [vmem:[#allocation11 + $0x40] ss:$8 sps:$4 sm:$0xff]  }
  0x6d   :  { %1316 = vmatpush3.bf16.msra.mxu1 %v1462_v32  ;;  %v1500_v30 = vld [vmem:[#allocation11 + $0x20] ss:$8 sps:$4 sm:$0xff]   ;;  %v1503_v32 = vld [vmem:[#allocation11 + $0x10] ss:$8 sps:$4 sm:$0xff]  }
  0x6e   :  { %1317 = vmatprep.subr.bf16.mxu1 %v1463_v34  ;;  %v1506_v34 = vld [vmem:[#allocation11] ss:$8 sps:$4 sm:$0xff]  }
  0x6f   :  { %343 = vmatpush1.bf16.msra.mxu0 %v1423_v13  ;;  %v1479_v13 = vld [vmem:[#allocation10 + $0x28] sm:$0xff]  }
  0x70   :  { %344 = vmatprep.subr.bf16.mxu0 %v1424_v15  ;;  %v1481_v15 = vld [vmem:[#allocation10 + $0x18] sm:$0xff]  }
  0x71   :  { %1318 = vmatpush3.bf16.msra.mxu1 %v1464_v36  ;;  %v1509_v36 = vld [vmem:[#allocation13 + $0x70] ss:$8 sps:$4 sm:$0xff]  }
  0x72   :  { %1319 = vmatprep.subr.bf16.mxu1 %v1465_v47  ;;  %v1524_v47 = vld [vmem:[#allocation13 + $0x20] ss:$8 sps:$4 sm:$0xff]  }
  0x73   :  { %345 = vmatpush1.bf16.msra.mxu0 %v1426_v20  ;;  %v1485_v20 = vld [vmem:[#allocation11 + $0x70] ss:$8 sps:$4 sm:$0xff]  }
  0x74   :  { %346 = vmatprep.subr.bf16.mxu0 %v1427_v23  ;;  %v1493_v23 = vld [vmem:[#allocation11 + $0x54] ss:$8 sps:$4 sm:$0xff]  }
  0x75   :  { %1320 = vmatpush3.bf16.msra.mxu1 %v1466_v48  ;;  %v1529_v48 = vld [vmem:[#allocation13 + $0x14] ss:$8 sps:$4 sm:$0xff]  }
  0x76   :  { %1321 = vmatprep.subr.bf16.mxu1 %v1467_v49  ;;  %v1527_v49 = vld [vmem:[#allocation13 + $0x10] ss:$8 sps:$4 sm:$0xff]  }
  0x77   :  { %347 = vmatpush2.bf16.msra.mxu0 %v1429_v24  ;;  %v1491_v24 = vld [vmem:[#allocation11 + $0x50] ss:$8 sps:$4 sm:$0xff]  }
  0x78   :  { %348 = vmatprep.subr.bf16.mxu0 %v1430_v25  ;;  %v1496_v25 = vld [vmem:[#allocation11 + $0x44] ss:$8 sps:$4 sm:$0xff]  }
  0x79   :  { %1322 = vmatpush3.bf16.msra.mxu1 %v1468_v50  ;;  %v1532_v50 = vld [vmem:[#allocation13 + $0x4] ss:$8 sps:$4 sm:$0xff]  }
  0x7a   :  { %1347 = vmatprep.subr.bf16.mxu1 %v1768_v51 }
  0x7b   :  { %349 = vmatpush2.bf16.msra.mxu0 %v1432_v29  ;;  %v1502_v29 = vld [vmem:[#allocation11 + $0x24] ss:$8 sps:$4 sm:$0xff]  }
  0x7c   :  { %350 = vmatprep.subr.bf16.mxu0 %v1433_v31  ;;  %v1505_v31 = vld [vmem:[#allocation11 + $0x14] ss:$8 sps:$4 sm:$0xff]  }
  0x7f   :  { %351 = vmatpush2.bf16.msra.mxu0 %v1435_v33  ;;  %v1508_v33 = vld [vmem:[#allocation11 + $0x4] ss:$8 sps:$4 sm:$0xff]  }
  0x80   :  { %352 = vmatprep.subr.bf16.mxu0 %v1436_v35  ;;  %v1770_v35 = vmov 0  }
  0x83   :  { %353 = vmatpush2.bf16.msra.mxu0 %v1438_v37  ;;  %v1511_v37 = vld [vmem:[#allocation13 + $0x74] ss:$8 sps:$4 sm:$0xff]  }
  0x84   :  { %354 = vmatprep.subr.bf16.mxu0 %v1439_v38  ;;  %v1514_v38 = vld [vmem:[#allocation13 + $0x64] ss:$8 sps:$4 sm:$0xff]  }
  0x87   :  { %355 = vmatpush2.bf16.msra.mxu0 %v1441_v39  ;;  %v1512_v39 = vld [vmem:[#allocation13 + $0x60] ss:$8 sps:$4 sm:$0xff]  }
  0x88   :  { %356 = vmatprep.subr.bf16.mxu0 %v1442_v40  ;;  %v1517_v40 = vld [vmem:[#allocation13 + $0x54] ss:$8 sps:$4 sm:$0xff]  }
  0x8b   :  { %357 = vmatpush2.bf16.msra.mxu0 %v1444_v41  ;;  %v1515_v41 = vld [vmem:[#allocation13 + $0x50] ss:$8 sps:$4 sm:$0xff]  }
  0x8c   :  { %358 = vmatprep.subr.bf16.mxu0 %v1445_v42  ;;  %v1520_v42 = vld [vmem:[#allocation13 + $0x44] ss:$8 sps:$4 sm:$0xff]  }
  0x8f   :  { %359 = vmatpush2.bf16.msra.mxu0 %v1447_v43  ;;  %v1518_v43 = vld [vmem:[#allocation13 + $0x40] ss:$8 sps:$4 sm:$0xff]  }
  0x90   :  { %360 = vmatprep.subr.bf16.mxu0 %v1448_v44  ;;  %v1523_v44 = vld [vmem:[#allocation13 + $0x34] ss:$8 sps:$4 sm:$0xff]  }
  0x93   :  { %361 = vmatpush2.bf16.msra.mxu0 %v1450_v45  ;;  %v1521_v45 = vld [vmem:[#allocation13 + $0x30] ss:$8 sps:$4 sm:$0xff]  }
  0x94   :  { %1102 = vmatprep.subr.bf16.mxu0 %v1511_v37 }
  0x96   :  { %363 = vmatmul.mubr.bf16.vlgmr.msra.gmra.mxu0 %v1189_v46  ;;  %v1526_v46 = vld [vmem:[#allocation13 + $0x24] ss:$8 sps:$4 sm:$0xff]  }
  0x97   :  { %1103 = vmatpush1.bf16.msra.mxu0 %v1509_v36 }
  0x98   :  { %1104 = vmatprep.subr.bf16.mxu0 %v1514_v38 }
  0x9b   :  { %1105 = vmatpush1.bf16.msra.mxu0 %v1512_v39 }
  0x9c   :  { %1106 = vmatprep.subr.bf16.mxu0 %v1517_v40 }
  0x9f   :  { %1107 = vmatpush1.bf16.msra.mxu0 %v1515_v41 }
  0xa0   :  { %1108 = vmatprep.subr.bf16.mxu0 %v1520_v42 }
  0xa3   :  { %1109 = vmatpush1.bf16.msra.mxu0 %v1518_v43 }
  0xa4   :  { %1110 = vmatprep.subr.bf16.mxu0 %v1523_v44 }
  0xa7   :  { %1111 = vmatpush1.bf16.msra.mxu0 %v1521_v45 }
  0xa8   :  { %1112 = vmatprep.subr.bf16.mxu0 %v1526_v46 }
  0xab   :  { %1113 = vmatpush1.bf16.msra.mxu0 %v1524_v47 }
  0xac   :  { %1114 = vmatprep.subr.bf16.mxu0 %v1529_v48 }
  0xaf   :  { %1115 = vmatpush1.bf16.msra.mxu0 %v1527_v49 }
  0xb0   :  { %1116 = vmatprep.subr.bf16.mxu0 %v1532_v50 }
 0x156   :  { %v364_v52 = vpop.f32.mrf.mxu0 }
 0x157   :  { %v371_v53 = vmax.f32 %v364_v52, 0.0  ;;  %v1535_v52 = vld [vmem:[#allocation13 + $0xf4] ss:$8 sps:$4 sm:$0xff]  }
 0x158   :  { %v366_v54 = vpop.f32.mrf.mxu0 }
 0x159   :  { %v372_v55 = vmax.f32 %v366_v54, 0.0  ;;  %v373_v59 = vpack.c.bf16 %v371_v53, %v371_v53  ;;  %v1533_v53 = vld [vmem:[#allocation13 + $0xf0] ss:$8 sps:$4 sm:$0xff]   ;;  %v1538_v54 = vld [vmem:[#allocation13 + $0xe4] ss:$8 sps:$4 sm:$0xff]  }
 0x15a   :  { %v368_v56 = vpop.f32.mrf.mxu0 }
 0x15b   :  { %v374_v57 = vpack.c.bf16 %v372_v55, %v372_v55  ;;  %v1536_v55 = vld [vmem:[#allocation13 + $0xe0] ss:$8 sps:$4 sm:$0xff]   ;;  %v1541_v56 = vld [vmem:[#allocation13 + $0xd4] ss:$8 sps:$4 sm:$0xff]  }
 0x15c   :  { %v369_v60 = vpop.f32.mrf.mxu0 }
 0x15d   :  { %535 = vmatprep.mubr.bf16.mxu1 %v374_v57  ;;  %v1539_v57 = vld [vmem:[#allocation13 + $0xd0] ss:$8 sps:$4 sm:$0xff]   ;;  %v1547_v60 = vld [vmem:[#allocation13 + $0xb4] ss:$8 sps:$4 sm:$0xff]  }
 0x15e   :  { %536 = vmatmul.mubr.bf16.vlgmr.msra.gmra.mxu1 %v373_v59  ;;  %v1542_v59 = vld [vmem:[#allocation13 + $0xc0] ss:$8 sps:$4 sm:$0xff]  }
 0x15f   :  { %1348 = vmatpush3.bf16.msra.mxu1 %v1469_v58  ;;  %1363 = vmatprep.mubr.msk.bf16.mxu1 %vm1769_vm0, %v1768_v51  ;;  %v1544_v58 = vld [vmem:[#allocation13 + $0xc4] ss:$8 sps:$4 sm:$0xff]  }
 0x160   :  { %1349 = vmatprep.subr.bf16.mxu1 %v1768_v51 }
 0x163   :  { %1350 = vmatpush3.bf16.msra.mxu1 %v1470_v61  ;;  %v1545_v61 = vld [vmem:[#allocation13 + $0xb0] ss:$8 sps:$4 sm:$0xff]  }
 0x164   :  { %1351 = vmatprep.subr.bf16.mxu1 %v1768_v51 }
 0x167   :  { %1352 = vmatpush3.bf16.msra.mxu1 %v1471_v62  ;;  %v1550_v62 = vld [vmem:[#allocation13 + $0xa4] ss:$8 sps:$4 sm:$0xff]  }
 0x168   :  { %1353 = vmatprep.subr.bf16.mxu1 %v1768_v51 }
 0x16b   :  { %1354 = vmatpush3.bf16.msra.mxu1 %v1472_v63  ;;  %v1548_v63 = vld [vmem:[#allocation13 + $0xa0] ss:$8 sps:$4 sm:$0xff]  }
 0x16c   :  { %1355 = vmatprep.subr.bf16.mxu1 %v1768_v51 }
 0x16f   :  { %1356 = vmatpush3.bf16.msra.mxu1 %v1473_v0  ;;  %v1239_v0 = vld [vmem:[%s1907_s4] ss:$0 sm:$0xff]  ;;  %s1771_s4 = smov [#allocation14]  }
 0x170   :  { %1357 = vmatprep.subr.bf16.mxu1 %v1768_v51 }
 0x173   :  { %1358 = vmatpush3.bf16.msra.mxu1 %v1474_v1 }
 0x174   :  { %1359 = vmatprep.subr.bf16.mxu1 %v1768_v51 }
 0x177   :  { %1360 = vmatpush3.bf16.msra.mxu1 %v1475_v2 }
 0x178   :  { %1361 = vmatprep.subr.bf16.mxu1 %v1768_v51 }
 0x17b   :  { %1362 = vmatpush3.bf16.msra.mxu1 %v1476_v3 }
 0x17c   :  { %1367 = vmatprep.subr.bf16.mxu1 %v1768_v51 }
 0x21e   :  { %v1323_v4 = vpop.f32.mrf.mxu1 }
 0x220   :  { %v1324_v5 = vpop.f32.mrf.mxu1 }
 0x221   :  { %v1325_v6 = vadd.f32 %v1324_v5, %v1323_v4 }
 0x222   :  { %v1326_v7 = vpop.f32.mrf.mxu1 }
 0x223   :  { %v543_v8 = vmax.f32 %v1325_v6, 0.0  ;;  %v1248_v6 = vld [vmem:[%s1909_s6] ss:$0 sm:$0xff]  ;;  %s1163_s6 = sshll.u32 %s1771_s4, 4  ;;  %s1164_s6 = int_to_ptr.vmem [resolvable:$true] %s1163_s6 }
 0x224   :  { %v1327_v9 = vpop.f32.mrf.mxu1  ;;  %s1705_s25 = scalar_lea.vmem %s1164_s6, 128  ;;  %p1710_p8 = scmp.lt.s32.totalorder %s1164_s6, %s1164_s6 }
 0x225   :  { %v544_v11 = vpack.c.bf16 %v543_v8, %v543_v8  ;;  %p1706_p7 = scmp.ne.s32.totalorder %s1164_s6, %s1705_s25  ;;  %p1711_p9 = scmp.lt.s32.totalorder %s1705_s25, %s1705_s25 }
 0x227   :  { %1364 = vmatmul.mubr.bf16.vlgmr.msra.gmra.mxu1 %v544_v11  ;;  %p1712_p10 = por %p1711_p9, %p1710_p8 }
 0x228   :  { %1368 = vmatpush3.bf16.msra.mxu1 %v1477_v10  ;;  %1383 = vmatprep.mubr.msk.bf16.mxu1 %vm1769_vm0, %v1768_v51 }
 0x229   :  { %1369 = vmatprep.subr.bf16.mxu1 %v1768_v51  ;;  %p1713_p11 = pnand %p1712_p10, %p1706_p7 }
 0x22c   :  { %1370 = vmatpush3.bf16.msra.mxu1 %v1478_v12 }
 0x22d   :  { %1371 = vmatprep.subr.bf16.mxu1 %v1768_v51 }
 0x230   :  { %1372 = vmatpush3.bf16.msra.mxu1 %v1479_v13  ;;  %v1553_v13 = vld [vmem:[#allocation13 + $0x94] ss:$8 sps:$4 sm:$0xff]  }
 0x231   :  { %1373 = vmatprep.subr.bf16.mxu1 %v1768_v51 }
 0x234   :  { %1374 = vmatpush3.bf16.msra.mxu1 %v1480_v14  ;;  %v1551_v14 = vld [vmem:[#allocation13 + $0x90] ss:$8 sps:$4 sm:$0xff]  }
 0x235   :  { %1375 = vmatprep.subr.bf16.mxu1 %v1768_v51 }
 0x238   :  { %1376 = vmatpush3.bf16.msra.mxu1 %v1481_v15  ;;  %v1556_v15 = vld [vmem:[#allocation13 + $0x84] ss:$8 sps:$4 sm:$0xff]  }
 0x239   :  { %1377 = vmatprep.subr.bf16.mxu1 %v1768_v51 }
 0x23c   :  { %1378 = vmatpush3.bf16.msra.mxu1 %v1482_v16  ;;  %v1554_v16 = vld [vmem:[#allocation13 + $0x80] ss:$8 sps:$4 sm:$0xff]  }
 0x23d   :  { %1379 = vmatprep.subr.bf16.mxu1 %v1768_v51 }
 0x240   :  { %1380 = vmatpush3.bf16.msra.mxu1 %v1483_v17 }
 0x241   :  { %1381 = vmatprep.subr.bf16.mxu1 %v1768_v51  ;;  %v1530_v51 = vld [vmem:[#allocation13] ss:$8 sps:$4 sm:$0xff]  }
 0x242   :  { %1117 = vmatpush1.bf16.msra.mxu0 %v1530_v51 }
 0x243   :  { %1118 = vmatprep.subr.bf16.mxu0 %v1535_v52 }
 0x244   :  { %1382 = vmatpush3.bf16.msra.mxu1 %v1484_v18 }
 0x245   :  { %865 = vmatprep.subr.bf16.mxu1 %v1487_v19 }
 0x246   :  { %1119 = vmatpush2.bf16.msra.mxu0 %v1533_v53 }
 0x247   :  { %1384 = vmatmul.mubr.bf16.vlgmr.msra.gmra.mxu1 %v544_v11  ;;  %1120 = vmatprep.subr.bf16.mxu0 %v1538_v54 }
 0x248   :  { %866 = vmatpush1.bf16.msra.mxu1 %v1485_v20  ;;  %897 = vmatprep.mubr.bf16.mxu1 %v1770_v35 }
 0x249   :  { %867 = vmatprep.subr.bf16.mxu1 %v1490_v22 }
 0x24a   :  { %1121 = vmatpush2.bf16.msra.mxu0 %v1536_v55 }
 0x24b   :  { %1122 = vmatprep.subr.bf16.mxu0 %v1541_v56 }
 0x24c   :  { %868 = vmatpush1.bf16.msra.mxu1 %v1488_v21 }
 0x24d   :  { %869 = vmatprep.subr.bf16.mxu1 %v1493_v23 }
 0x24e   :  { %1123 = vmatpush2.bf16.msra.mxu0 %v1539_v57 }
 0x24f   :  { %1124 = vmatprep.subr.bf16.mxu0 %v1544_v58 }
 0x250   :  { %870 = vmatpush1.bf16.msra.mxu1 %v1491_v24 }
 0x251   :  { %871 = vmatprep.subr.bf16.mxu1 %v1496_v25 }
 0x252   :  { %1125 = vmatpush2.bf16.msra.mxu0 %v1542_v59 }
 0x253   :  { %1126 = vmatprep.subr.bf16.mxu0 %v1547_v60 }
 0x254   :  { %872 = vmatpush1.bf16.msra.mxu1 %v1494_v26 }
 0x255   :  { %873 = vmatprep.subr.bf16.mxu1 %v1499_v27 }
 0x256   :  { %1127 = vmatpush2.bf16.msra.mxu0 %v1545_v61 }
 0x257   :  { %1128 = vmatprep.subr.bf16.mxu0 %v1550_v62 }
 0x258   :  { %874 = vmatpush1.bf16.msra.mxu1 %v1497_v28 }
 0x259   :  { %875 = vmatprep.subr.bf16.mxu1 %v1502_v29 }
 0x25a   :  { %1129 = vmatpush2.bf16.msra.mxu0 %v1548_v63 }
 0x25b   :  { %1130 = vmatprep.subr.bf16.mxu0 %v1553_v13 }
 0x25c   :  { %876 = vmatpush1.bf16.msra.mxu1 %v1500_v30 }
 0x25d   :  { %877 = vmatprep.subr.bf16.mxu1 %v1505_v31 }
 0x25e   :  { %1131 = vmatpush2.bf16.msra.mxu0 %v1551_v14 }
 0x25f   :  { %1132 = vmatprep.subr.bf16.mxu0 %v1556_v15 }
 0x260   :  { %878 = vmatpush1.bf16.msra.mxu1 %v1503_v32 }
 0x261   :  { %879 = vmatprep.subr.bf16.mxu1 %v1508_v33 }
 0x262   :  { %1133 = vmatpush2.bf16.msra.mxu0 %v1554_v16 }
 0x264   :  { %880 = vmatpush1.bf16.msra.mxu1 %v1506_v34 }
 0x2e7   :  { %v650_v1 = vpop.f32.mrf.mxu1 }
 0x2e8   :  { %v651_v2 = vadd.f32 %v1239_v0, %v650_v1 }
 0x2e9   :  { %v1365_v3 = vpop.f32.mrf.mxu1 }
 0x2ea   :  { %656 = vst [vmem:[#allocation14] sm:$0xff] %v651_v2 }
 0x2eb   :  { %v653_v4 = vpop.f32.mrf.mxu1 }
 0x2ed   :  { %v1366_v5 = vpop.f32.mrf.mxu1 }
 0x307   :  { %v762_v7 = vpop.f32.mrf.mxu1 }
 0x308   :  { %v763_v8 = vadd.f32 %v1248_v6, %v762_v7 }
 0x309   :  { %v1385_v9 = vpop.f32.mrf.mxu1 }
 0x30a   :  { %v768_v10 = vpack.c.bf16 %v763_v8, %v763_v8 }
 0x30b   :  { %v765_v11 = vpop.f32.mrf.mxu1 }
 0x30c   :  { %898 = vmatmul.mubr.bf16.vlgmr.msra.gmra.mxu1 %v768_v10 }
 0x30d   :  { %v1386_v12 = vpop.f32.mrf.mxu1 }
 0x3cc   :  { %v899_v17 = vpop.f32.mrf.mxu1 }
 0x3cd   :  { %v906_v18 = vmax.f32 %v899_v17, 0.0 }
 0x3ce   :  { %v901_v19 = vpop.f32.mrf.mxu1 }
 0x3cf   :  { %v907_v20 = vmax.f32 %v901_v19, 0.0  ;;  %v908_v23 = vpack.c.bf16 %v906_v18, %v906_v18 }
 0x3d0   :  { %v903_v21 = vpop.f32.mrf.mxu1 }
 0x3d1   :  { %v909_v22 = vpack.c.bf16 %v907_v20, %v907_v20 }
 0x3d2   :  { %v904_v24 = vpop.f32.mrf.mxu1 }
 0x3d3   :  { %1134 = vmatprep.mubr.bf16.mxu0 %v909_v22 }
 0x3d4   :  { %1135 = vmatmul.mubr.bf16.vlgmr.msra.gmra.mxu0 %v908_v23 }
 0x3d5   :  { %1716 = shalt.err (!%p1713_p11)
}
 0x3d6   :  { %1166 = dma.vmem_to_hbm [thread:$0]  %s1164_s6, 128, %s1912_s9, [#allocation4]  }
 0x3d7   :  { %s1772_s11 = smov [#allocation15]  }
 0x3d8   :  { %s1173_s12 = sshll.u32 %s1772_s11, 4  ;;  %s1174_s12 = int_to_ptr.vmem [resolvable:$true] %s1173_s12 }
 0x3d9   :  { %s1725_s9 = scalar_lea.vmem %s1174_s12, 256  ;;  %p1730_p13 = scmp.lt.s32.totalorder %s1174_s12, %s1174_s12 }
 0x3da   :  { %p1726_p12 = scmp.ne.s32.totalorder %s1174_s12, %s1725_s9  ;;  %p1731_p0 = scmp.lt.s32.totalorder %s1725_s9, %s1725_s9 }
 0x3dc   :  { %p1732_p1 = por %p1731_p0, %p1730_p13 }
 0x3de   :  { %p1733_p2 = pnand %p1732_p1, %p1726_p12 }
 0x494   :  { %v1136_v25 = vpop.f32.mrf.mxu0 }
 0x495   :  { %v1305_v26 = vmul.f32 -1.442695, %v1136_v25 }
 0x496   :  { %v1138_v27 = vpop.f32.mrf.mxu0 }
 0x497   :  { %1557 = vpow2.f32 %v1305_v26  ;;  %v1306_v28 = vmul.f32 -1.442695, %v1138_v27 }
 0x498   :  { %v1140_v29 = vpop.f32.mrf.mxu0 }
 0x499   :  { %1559 = vpow2.f32 %v1306_v28 }
 0x49a   :  { %v1141_v30 = vpop.f32.mrf.mxu0 }
 0x4a4   :  { %v1558_v31 = vpop.eup %1557 }
 0x4a5   :  { %v1149_v32 = vadd.f32 1.0, %v1558_v31 }
 0x4a6   :  { %v1560_v33 = vpop.eup %1559 }
 0x4a7   :  { %1561 = vrcp.f32 %v1149_v32  ;;  %v1150_v34 = vadd.f32 1.0, %v1560_v33 }
 0x4a9   :  { %1563 = vrcp.f32 %v1150_v34 }
 0x4b4   :  { %v1562_v35 = vpop.eup %1561 }
 0x4b5   :  { %1155 = vst [vmem:[#allocation15] sm:$0xff] %v1562_v35 }
 0x4b6   :  { %v1564_v36 = vpop.eup %1563 }
 0x4b7   :  { %1156 = vst [vmem:[#allocation15 + $0x8] sm:$0xff] %v1564_v36 }
 0x4b8   :  { %1736 = shalt.err (!%p1733_p2)
}
 0x4b9   :  { %1176 = dma.vmem_to_hbm [thread:$0]  %s1174_s12, 256, %s1913_s10, [#allocation16]  }
 0x4ba   :  { %1753 = dma.done.wait [#allocation4], 128  }
 0x4bb   :  { %1754 = vsyncadd [#allocation4], 4294967168 }
 0x4bc   :  { %1755 = dma.done.wait [#allocation16], 256  }
 0x4bd   :  { %1756 = vsyncadd [#allocation16], 4294967040 }
 0x4be   :  { %1183 = vsyncpa [#allocation3], 1 }
 0x4bf   :  { %1184 = vsyncpa [#allocation6], 1 }
 0x4c0   :  { %1185 = vsyncpa [#allocation9], 1 }
 0x4c1   :  { %1186 = vsyncpa [#allocation12], 1 }
 0x4c2   :  { %1187 = vsyncpa [#allocation4], 1 }
 0x4c3   :  { %1188 = vsyncpa [#allocation16], 1 }

</bundles_post_ra>
